<compile_context>
chip_gen: v5e
topology: v5e:2x2
jax: 0.10.0
libtpu: 0.0.40
codegen_flags: <defaults>
</compile_context>

<pallas_src>
import math

import jax
import jax.numpy as jnp
from jax.experimental import pallas as pl
from jax.experimental.pallas import tpu as pltpu


def _layerscale_kernel(x_ref, gamma_ref, o_ref):
    # x_ref: (tile_rows, tile_dim); gamma_ref: (1, tile_dim), broadcast over rows.
    o_ref[...] = (x_ref[...] * gamma_ref[...]).astype(o_ref.dtype)


def layer_scale(
    x: jax.Array,
    gamma: jax.Array,
    *,
    out_dtype=None,
    target_block_bytes: int = 4 * 1024 * 1024,  # ~4 MiB per x block
) -> jax.Array:
    """Computes x * gamma where gamma has shape (dim,) and dim == x.shape[-1].

    out_dtype=None keeps PyTorch-style promotion (f32 out for bf16 x / f32 gamma).
    Pass out_dtype=x.dtype to cut write bandwidth for bf16 activations (opt-in,
    semantics-changing).
    """
    orig_shape = x.shape
    dim = orig_shape[-1]
    assert gamma.shape == (dim,), f"gamma shape {gamma.shape} != ({dim},)"

    if out_dtype is None:
        out_dtype = jnp.promote_types(x.dtype, gamma.dtype)

    x2d = x.reshape(-1, dim)
    rows = x2d.shape[0]
    g = gamma
    lane_dim = dim

    # Lane-dense repack: a last dim that is not a multiple of 128 lowers to
    # lane-padded vregs and masked partial stores.  If the flat row-major view
    # divides by L = lcm(dim, 128), re-view it as an L-wide matrix (free
    # reshape) and tile gamma to match.  Covers dim=32, 96, 300, ...
    if dim % 128 != 0 and rows * dim > 0:
        L = (dim * 128) // math.gcd(dim, 128)
        if (rows * dim) % L == 0:
            rep = L // dim
            x2d = x2d.reshape(-1, L)
            g = jnp.tile(gamma, rep)
            lane_dim = L
            rows = x2d.shape[0]
        # else: fall through — rare shapes take masked partial stores.
        # TODO(synk): could pad the feature axis, but that adds full extra
        # HBM passes which usually costs more than the masked stores.

    gamma2d = g.reshape(1, lane_dim)

    x_bytes = jnp.dtype(x.dtype).itemsize
    o_bytes = jnp.dtype(out_dtype).itemsize
    g_bytes = jnp.dtype(g.dtype).itemsize
    elem_bytes = max(x_bytes, o_bytes)

    # Packed sublane tile: 8 rows for 4-byte, 16 for 2-byte, 32 for 1-byte dtypes.
    sub = {1: 32, 2: 16}.get(x_bytes, 8)

    # Feature-axis tiling only if even a sublane-high full-width block exceeds
    # the budget; tile width is a multiple of 128, ragged last block via cdiv.
    if sub * lane_dim * elem_bytes > target_block_bytes and lane_dim > 128:
        tile_dim = max(128, (target_block_bytes // (sub * elem_bytes)) // 128 * 128)
        tile_dim = min(tile_dim, lane_dim)
    else:
        tile_dim = lane_dim
    dim_blocks = pl.cdiv(lane_dim, tile_dim)

    # Row tiling: ~target_block_bytes per block, rounded to the sublane pack.
    bytes_per_row = max(1, tile_dim * elem_bytes)
    tile_rows = max(sub, (target_block_bytes // bytes_per_row) // sub * sub)
    if tile_rows >= rows:
        if rows >= 2 * sub:
            # Split into (at least) 2 row blocks so both v7x TensorCores get work.
            half = -(-rows // 2)
            tile_rows = -(-half // sub) * sub
        else:
            tile_rows = rows  # single full-extent block (always legal)
    row_blocks = pl.cdiv(rows, tile_rows)  # ragged last block is fine (elementwise)

    # VMEM limit from the real footprint: double-buffered x + out blocks + gamma,
    # plus 25% slack.  Stays well inside v7x's 64 MiB even at 4 MiB blocks.
    blk_bytes = tile_rows * tile_dim * (x_bytes + o_bytes)
    vmem_limit = 2 * blk_bytes + 2 * tile_dim * g_bytes
    vmem_limit = int(min(max(vmem_limit + vmem_limit // 4 + (1 << 20), 8 << 20), 100 << 20))

    if dim_blocks == 1:
        # Collapse the degenerate column axis: 1-D grid, gamma block constant
        # -> resident in VMEM with zero re-DMA.
        grid = (row_blocks,)
        in_specs = [
            pl.BlockSpec((tile_rows, tile_dim), lambda i: (i, 0)),
            pl.BlockSpec((1, tile_dim), lambda i: (0, 0)),
        ]
        out_specs = pl.BlockSpec((tile_rows, tile_dim), lambda i: (i, 0))
        dim_sems = ("parallel",)
    else:
        grid = (row_blocks, dim_blocks)
        in_specs = [
            pl.BlockSpec((tile_rows, tile_dim), lambda i, j: (i, j)),
            pl.BlockSpec((1, tile_dim), lambda i, j: (0, j)),
        ]
        out_specs = pl.BlockSpec((tile_rows, tile_dim), lambda i, j: (i, j))
        dim_sems = ("parallel", "parallel")

    out = pl.pallas_call(
        _layerscale_kernel,
        out_shape=jax.ShapeDtypeStruct((rows, lane_dim), out_dtype),
        grid_spec=pltpu.PrefetchScalarGridSpec(
            num_scalar_prefetch=0,
            grid=grid,
            in_specs=in_specs,
            out_specs=out_specs,
        ),
        compiler_params=pltpu.CompilerParams(
            dimension_semantics=dim_sems,
            vmem_limit_bytes=vmem_limit,
        ),
    )(x2d, gamma2d)

    return out.reshape(orig_shape)


if __name__ == "__main__":
    key = jax.random.PRNGKey(0)
    init_values = 1e-5

    # Case 1: dim=32 (< 128, divides 128) -> lcm repack to 128-wide view.
    x1 = jax.random.normal(key, (2, 8, 32), dtype=jnp.float32)
    gamma1 = init_values * jnp.ones((32,), dtype=jnp.float32)
    out1 = jax.block_until_ready(layer_scale(x1, gamma1))
    ref1 = x1 * gamma1
    assert out1.shape == x1.shape
    assert jnp.allclose(out1, ref1, atol=1e-7, rtol=1e-6), "mismatch (dim=32)"

    # Case 2: dim=256 (multiple of 128) -> direct lane-dense path, 2 row blocks.
    k2 = jax.random.fold_in(key, 1)
    x2 = jax.random.normal(k2, (2, 8, 256), dtype=jnp.float32)
    gamma2 = init_values * jnp.ones((256,), dtype=jnp.float32)
    out2 = jax.block_until_ready(layer_scale(x2, gamma2))
    ref2 = x2 * gamma2
    assert out2.shape == x2.shape
    assert jnp.allclose(out2, ref2, atol=1e-7, rtol=1e-6), "mismatch (dim=256)"

    # Case 3: dim=96 (does not divide 128) -> lcm(96,128)=384 repack path.
    k3 = jax.random.fold_in(key, 2)
    x3 = jax.random.normal(k3, (2, 8, 96), dtype=jnp.float32)
    gamma3 = init_values * jnp.ones((96,), dtype=jnp.float32)
    out3 = jax.block_until_ready(layer_scale(x3, gamma3))
    ref3 = x3 * gamma3
    assert out3.shape == x3.shape
    assert jnp.allclose(out3, ref3, atol=1e-7, rtol=1e-6), "mismatch (dim=96)"

    # Case 4: bf16 activations with f32 gamma, opt-in bf16 output.
    k4 = jax.random.fold_in(key, 3)
    x4 = jax.random.normal(k4, (2, 8, 256), dtype=jnp.bfloat16)
    gamma4 = init_values * jnp.ones((256,), dtype=jnp.float32)
    out4 = jax.block_until_ready(layer_scale(x4, gamma4, out_dtype=jnp.bfloat16))
    ref4 = (x4 * gamma4).astype(jnp.bfloat16)
    assert out4.shape == x4.shape and out4.dtype == jnp.bfloat16
    assert jnp.allclose(out4.astype(jnp.float32), ref4.astype(jnp.float32),
                        atol=1e-6, rtol=1e-2), "mismatch (bf16)"

    print("KERNEL_OK")
</pallas_src>

<mosaic_0001>
module attributes {stable_mosaic.version = 11 : i64} {
  func.func @_layerscale_kernel(%arg0: i32, %arg1: memref<4x128xf32, #tpu.memory_space<vmem>>, %arg2: memref<1x128xf32, #tpu.memory_space<vmem>>, %arg3: memref<4x128xf32, #tpu.memory_space<vmem>>) attributes {dimension_semantics = [#tpu.dimension_semantics<parallel>], iteration_bounds = array<i64: 1>, scalar_prefetch = 0 : i64, scratch_operands = 0 : i64, tpu.core_type = #tpu.core_type<tc>, window_params = [{transform_indices = @transform_0, window_bounds = array<i64: 4, 128>}, {pipeline_mode = #tpu.pipeline_mode<synchronous>, transform_indices = @transform_1, window_bounds = array<i64: 1, 128>}, {transform_indices = @transform_2, window_bounds = array<i64: 4, 128>}]} {
    %c0 = arith.constant 0 : index
    %c0_0 = arith.constant 0 : index
    %0 = vector.load %arg1[%c0, %c0_0] : memref<4x128xf32, #tpu.memory_space<vmem>>, vector<4x128xf32>
    %c0_1 = arith.constant 0 : index
    %c0_2 = arith.constant 0 : index
    %1 = vector.load %arg2[%c0_1, %c0_2] : memref<1x128xf32, #tpu.memory_space<vmem>>, vector<1x128xf32>
    %2 = vector.broadcast %1 : vector<1x128xf32> to vector<4x128xf32>
    %3 = arith.mulf %0, %2 : vector<4x128xf32>
    %c0_3 = arith.constant 0 : index
    %c0_4 = arith.constant 0 : index
    %4 = vector.load %arg3[%c0_3, %c0_4] : memref<4x128xf32, #tpu.memory_space<vmem>>, vector<4x128xf32>
    tpu.vector_store %arg3[%c0_3, %c0_4], %3 {strides = array<i32>} : memref<4x128xf32, #tpu.memory_space<vmem>>, vector<4x128xf32>,
    return
  }
  func.func @transform_0(%arg0: i32) -> (i32, i32) {
    %c0_i32 = arith.constant 0 : i32
    %c0_i32_0 = arith.constant 0 : i32
    return %arg0, %c0_i32 : i32, i32
  }
  func.func @transform_1(%arg0: i32) -> (i32, i32) {
    %c0_i32 = arith.constant 0 : i32
    %c0_i32_0 = arith.constant 0 : i32
    %c0_i32_1 = arith.constant 0 : i32
    return %c0_i32, %c0_i32_0 : i32, i32
  }
  func.func @transform_2(%arg0: i32) -> (i32, i32) {
    %c0_i32 = arith.constant 0 : i32
    %c0_i32_0 = arith.constant 0 : i32
    return %arg0, %c0_i32 : i32, i32
  }
}

</mosaic_0001>

<bundles_post_ra>
// kernel: tpu_custom_call.1
= control target key start
LH: loop header
LB: loop body
LE: loop exit
PB: predicated region body
PF: predicated region fallthrough
CT: control target
= control target key end

     0   :  { %7 = vsyncpa [#allocation3], 0  ;;  %s174_s0 = inlined_call_operand.hbm [shape: f32[4,128], index: 0, kind: input, shape index: {}]   ;;  %s175_s1 = inlined_call_operand.hbm [shape: f32[1,128], index: 1, kind: input, shape index: {}]   ;;  %s176_s2 = inlined_call_operand.hbm [shape: f32[4,128], index: 2, kind: output, shape index: {}]  }
   0x1   :  { %8 = vsyncpa [#allocation6], 0 }
   0x2   :  { %9 = vsyncpa [#allocation4], 0  ;;  %s15_s11 = sshll.u32 %s174_s0, 4  ;;  %s147_s12 = smov [#allocation2]   ;;  %s16_s11 = int_to_ptr.hbm [resolvable:$true] %s15_s11 }
   0x3   :  { %s17_s13 = sshll.u32 %s147_s12, 4  ;;  %s26_s16 = sshll.u32 %s175_s1, 4  ;;  %s18_s13 = int_to_ptr.vmem [resolvable:$true] %s17_s13  ;;  %s27_s16 = int_to_ptr.hbm [resolvable:$true] %s26_s16 }
   0x4   :  { %20 = dma.hbm_to_vmem [thread:$0]  %s16_s11, 64, %s18_s13, [#allocation3]  }
   0x5   :  { %s148_s17 = smov [#allocation5]  }
   0x6   :  { %s28_s18 = sshll.u32 %s148_s17, 4  ;;  %s29_s18 = int_to_ptr.vmem [resolvable:$true] %s28_s18 }
   0x7   :  { %31 = dma.hbm_to_vmem [thread:$0]  %s27_s16, 16, %s29_s18, [#allocation6]  }
   0x8   :  { %141 = dma.done.wait [#allocation3], 64  }
   0x9   :  { %142 = vsyncadd [#allocation3], 4294967232 }
   0xa   :  { %143 = dma.done.wait [#allocation6], 16  }
   0xb   :  { %144 = vsyncadd [#allocation6], 4294967280  ;;  %s149_s19 = smov [#allocation7]   ;;  %s54_s22 = sshll.u32 %s176_s2, 4  ;;  %v40_v0 = vld [vmem:[#allocation2] sm:$0xf]  ;;  %s55_s22 = int_to_ptr.hbm [resolvable:$true] %s54_s22 }
   0xc   :  { %s52_s0 = sshll.u32 %s149_s19, 4  ;;  %v68_v1 = vld [vmem:[#allocation5] ss:$0 sm:$0xff]  ;;  %s53_s0 = int_to_ptr.vmem [resolvable:$true] %s52_s0 }
   0xd   :  { %v45_v2 = vmul.f32 %v68_v1, %v40_v0 }
   0xf   :  { %46 = vst [vmem:[#allocation7] sm:$0xf] %v45_v2 }
  0x10   :  { %57 = dma.vmem_to_hbm [thread:$0]  %s53_s0, 64, %s55_s22, [#allocation4]  }
  0x11   :  { %145 = dma.done.wait [#allocation4], 64  }
  0x12   :  { %146 = vsyncadd [#allocation4], 4294967232 }
  0x13   :  { %62 = vsyncpa [#allocation3], 1 }
  0x14   :  { %63 = vsyncpa [#allocation6], 1 }
  0x15   :  { %64 = vsyncpa [#allocation4], 1 }

</bundles_post_ra>
